<compile_context>
chip_gen: v6e
topology: v6e:2x2x1
jax: 0.10.0
libtpu: 0.0.40
codegen_flags: <defaults>
</compile_context>

<pallas_src>
import functools

import jax
import jax.numpy as jnp
from jax.experimental import pallas as pl
from jax.experimental.pallas import tpu as pltpu

EPS = 1e-5
LANES = 128

# Row offsets inside the packed parameter slab (all multiples of 8 -> every
# weight view is tile-aligned, no in-kernel relayout copies).
_W1_OFF = 0            # (128,128): rows 0-1 = fc1 weight (in=2, out=32), rest zero
_W2_OFF = 128          # (128,128): rows 0-31, cols 0-63 = fc2 weight
_W3_OFF = 256          # (128,128): rows 0-63, cols 0-31 = fc3 weight
_W4_OFF = 384          # (128,128): rows 0-31 = fc4 weight, column replicated over 128 lanes
_VEC_OFF = 512         # 8 rows: g1, be1, g2, be2, g3, be3, b4(replicated), pad
_SLAB_ROWS = 520


def _mlp_kernel(x_ref, p_ref, o_ref):
    def bn_relu(h, g, be):
        # Training-mode BatchNorm1d fused with ReLU:
        # d = h - mean ; s = gamma * rsqrt(var + eps) ; out = max(d*s + beta, 0)
        mean = jnp.mean(h, axis=0, keepdims=True)
        d = h - mean
        var = jnp.mean(d * d, axis=0, keepdims=True)
        s = g * jax.lax.rsqrt(var + EPS)
        return jnp.maximum(d * s + be, 0.0)

    x = x_ref[...]                                          # (B,128); cols 0..1 hold the input

    w1r0 = p_ref[_W1_OFF + 0:_W1_OFF + 1, :]                # (1,128)
    w1r1 = p_ref[_W1_OFF + 1:_W1_OFF + 2, :]
    w2 = p_ref[_W2_OFF:_W2_OFF + LANES, :]                  # (128,128) zero-padded
    w3 = p_ref[_W3_OFF:_W3_OFF + LANES, :]
    w4 = p_ref[_W4_OFF:_W4_OFF + LANES, :]
    g1 = p_ref[_VEC_OFF + 0:_VEC_OFF + 1, :]
    be1 = p_ref[_VEC_OFF + 1:_VEC_OFF + 2, :]
    g2 = p_ref[_VEC_OFF + 2:_VEC_OFF + 3, :]
    be2 = p_ref[_VEC_OFF + 3:_VEC_OFF + 4, :]
    g3 = p_ref[_VEC_OFF + 4:_VEC_OFF + 5, :]
    be3 = p_ref[_VEC_OFF + 5:_VEC_OFF + 6, :]
    b4 = p_ref[_VEC_OFF + 6:_VEC_OFF + 7, :]

    # fc1: K=2 -> two VPU broadcast FMAs (no serialized MXU round trip).
    # Pre-BN biases b1/b2/b3 are omitted: they cancel exactly under batch-stat BN.
    h = x[:, 0:1] * w1r0 + x[:, 1:2] * w1r1                 # (B,128); lanes >=32 stay zero
    h = bn_relu(h, g1, be1)

    h = bn_relu(jnp.dot(h, w2, preferred_element_type=jnp.float32), g2, be2)
    h = bn_relu(jnp.dot(h, w3, preferred_element_type=jnp.float32), g3, be3)

    # fc4: weight column replicated over all 128 output lanes -> every lane
    # carries the same scalar, giving a lane-dense, unmasked output store.
    out = jnp.dot(h, w4, preferred_element_type=jnp.float32) + b4
    o_ref[...] = jax.nn.sigmoid(out)


def pack_params(params):
    """Pack all live parameters into one lane-aligned (520,128) f32 slab."""
    def pad_mat(w):
        out = jnp.zeros((LANES, LANES), jnp.float32)
        return out.at[: w.shape[0], : w.shape[1]].set(w.astype(jnp.float32))

    def pad_row(v):
        v = jnp.reshape(v.astype(jnp.float32), (1, -1))
        out = jnp.zeros((1, LANES), jnp.float32)
        return out.at[:, : v.shape[1]].set(v)

    w4_rep = jnp.tile(params["w4"].astype(jnp.float32), (1, LANES))          # (32,128)
    b4_rep = jnp.tile(jnp.reshape(params["b4"], (1, 1)).astype(jnp.float32),
                      (1, LANES))                                            # (1,128)

    vec_rows = jnp.concatenate(
        [pad_row(params["g1"]), pad_row(params["be1"]),
         pad_row(params["g2"]), pad_row(params["be2"]),
         pad_row(params["g3"]), pad_row(params["be3"]),
         b4_rep, jnp.zeros((1, LANES), jnp.float32)], axis=0)                # (8,128)

    slab = jnp.concatenate(
        [pad_mat(params["w1"]), pad_mat(params["w2"]),
         pad_mat(params["w3"]), pad_mat(w4_rep), vec_rows], axis=0)
    assert slab.shape == (_SLAB_ROWS, LANES), slab.shape
    return slab


@jax.jit
def mlp_forward(x, slab):
    """x: (B, 2) float32; slab: packed params from pack_params."""
    B = x.shape[0]
    # Full batch in one block: training-mode BN needs full-batch statistics.
    assert B <= 8192, "single-block kernel: batch must fit comfortably in VMEM"
    x_pad = jnp.zeros((B, LANES), jnp.float32).at[:, : x.shape[1]].set(
        x.astype(jnp.float32))
    out = pl.pallas_call(
        _mlp_kernel,
        out_shape=jax.ShapeDtypeStruct((B, LANES), jnp.float32),
        in_specs=[pl.BlockSpec(memory_space=pltpu.VMEM),
                  pl.BlockSpec(memory_space=pltpu.VMEM)],
        out_specs=pl.BlockSpec(memory_space=pltpu.VMEM),
        compiler_params=pltpu.CompilerParams(vmem_limit_bytes=32 * 1024 * 1024),
    )(x_pad, slab)
    return out[:, :1]


def init_params(key):
    """PyTorch-style Linear init (U[-1/sqrt(fan_in), ..]); BN gamma=1, beta=0.
    Weights stored pre-transposed as (in, out). b1/b2/b3 are kept for interface
    fidelity but are mathematically redundant (they cancel before batch-stat BN)."""
    dims = [(2, 32), (32, 64), (64, 32), (32, 1)]
    params = {}
    keys = jax.random.split(key, 2 * len(dims))
    for i, (fin, fout) in enumerate(dims):
        bound = 1.0 / (fin ** 0.5)
        params[f"w{i+1}"] = jax.random.uniform(
            keys[2 * i], (fin, fout), jnp.float32, -bound, bound)
        params[f"b{i+1}"] = jax.random.uniform(
            keys[2 * i + 1], (1, fout), jnp.float32, -bound, bound)
        if i < 3:
            params[f"g{i+1}"] = jnp.ones((1, fout), jnp.float32)
            params[f"be{i+1}"] = jnp.zeros((1, fout), jnp.float32)
    return params


def mlp_reference(x, params):
    """Pure-JAX reference replicating the PyTorch forward() (training-mode BN)."""
    def bn(h, g, be):
        mean = jnp.mean(h, axis=0, keepdims=True)
        var = jnp.mean((h - mean) ** 2, axis=0, keepdims=True)
        return (h - mean) * jax.lax.rsqrt(var + EPS) * g + be

    dot = functools.partial(jnp.dot, precision=jax.lax.Precision.HIGHEST)
    h = jax.nn.relu(bn(dot(x, params["w1"]) + params["b1"], params["g1"], params["be1"]))
    h = jax.nn.relu(bn(dot(h, params["w2"]) + params["b2"], params["g2"], params["be2"]))
    h = jax.nn.relu(bn(dot(h, params["w3"]) + params["b3"], params["g3"], params["be3"]))
    return jax.nn.sigmoid(dot(h, params["w4"]) + params["b4"])


if __name__ == "__main__":
    key = jax.random.PRNGKey(0)
    pkey, xkey = jax.random.split(key)
    params = init_params(pkey)
    slab = pack_params(params)

    B = 8
    x = jax.random.normal(xkey, (B, 2), dtype=jnp.float32)

    out = jax.block_until_ready(mlp_forward(x, slab))
    ref = jax.block_until_ready(mlp_reference(x, params))

    assert out.shape == (B, 1), out.shape
    assert bool(jnp.all(jnp.isfinite(out)))
    assert bool(jnp.all((out >= 0.0) & (out <= 1.0)))
    assert bool(jnp.allclose(out, ref, atol=1e-3, rtol=1e-3)), (out, ref)
    print("KERNEL_OK")
</pallas_src>

<mosaic_0001>
module attributes {stable_mosaic.version = 11 : i64} {
  func.func @_mlp_kernel(%arg0: memref<8x128xf32, #tpu.memory_space<vmem>>, %arg1: memref<520x128xf32, #tpu.memory_space<vmem>>, %arg2: memref<8x128xf32, #tpu.memory_space<vmem>>) attributes {dimension_semantics = [], scalar_prefetch = 0 : i64, scratch_operands = 0 : i64, tpu.core_type = #tpu.core_type<tc>} {
    %c0 = arith.constant 0 : index
    %c0_0 = arith.constant 0 : index
    %0 = vector.load %arg0[%c0, %c0_0] : memref<8x128xf32, #tpu.memory_space<vmem>>, vector<8x128xf32>
    %c0_1 = arith.constant 0 : index
    %c0_2 = arith.constant 0 : index
    %1 = vector.load %arg1[%c0_1, %c0_2] : memref<520x128xf32, #tpu.memory_space<vmem>>, vector<1x128xf32>
    %c1 = arith.constant 1 : index
    %c0_3 = arith.constant 0 : index
    %2 = vector.load %arg1[%c1, %c0_3] : memref<520x128xf32, #tpu.memory_space<vmem>>, vector<1x128xf32>
    %c128 = arith.constant 128 : index
    %c0_4 = arith.constant 0 : index
    %3 = vector.load %arg1[%c128, %c0_4] : memref<520x128xf32, #tpu.memory_space<vmem>>, vector<128x128xf32>
    %c256 = arith.constant 256 : index
    %c0_5 = arith.constant 0 : index
    %4 = vector.load %arg1[%c256, %c0_5] : memref<520x128xf32, #tpu.memory_space<vmem>>, vector<128x128xf32>
    %c384 = arith.constant 384 : index
    %c0_6 = arith.constant 0 : index
    %5 = vector.load %arg1[%c384, %c0_6] : memref<520x128xf32, #tpu.memory_space<vmem>>, vector<128x128xf32>
    %c512 = arith.constant 512 : index
    %c0_7 = arith.constant 0 : index
    %6 = vector.load %arg1[%c512, %c0_7] : memref<520x128xf32, #tpu.memory_space<vmem>>, vector<1x128xf32>
    %c513 = arith.constant 513 : index
    %c0_8 = arith.constant 0 : index
    %7 = vector.load %arg1[%c513, %c0_8] : memref<520x128xf32, #tpu.memory_space<vmem>>, vector<1x128xf32>
    %c514 = arith.constant 514 : index
    %c0_9 = arith.constant 0 : index
    %8 = vector.load %arg1[%c514, %c0_9] : memref<520x128xf32, #tpu.memory_space<vmem>>, vector<1x128xf32>
    %c515 = arith.constant 515 : index
    %c0_10 = arith.constant 0 : index
    %9 = vector.load %arg1[%c515, %c0_10] : memref<520x128xf32, #tpu.memory_space<vmem>>, vector<1x128xf32>
    %c516 = arith.constant 516 : index
    %c0_11 = arith.constant 0 : index
    %10 = vector.load %arg1[%c516, %c0_11] : memref<520x128xf32, #tpu.memory_space<vmem>>, vector<1x128xf32>
    %c517 = arith.constant 517 : index
    %c0_12 = arith.constant 0 : index
    %11 = vector.load %arg1[%c517, %c0_12] : memref<520x128xf32, #tpu.memory_space<vmem>>, vector<1x128xf32>
    %c518 = arith.constant 518 : index
    %c0_13 = arith.constant 0 : index
    %12 = vector.load %arg1[%c518, %c0_13] : memref<520x128xf32, #tpu.memory_space<vmem>>, vector<1x128xf32>
    %13 = vector.extract_strided_slice %0 {offsets = [0, 0], sizes = [8, 1], strides = [1, 1]} : vector<8x128xf32> to vector<8x1xf32>
    %14 = vector.broadcast %13 : vector<8x1xf32> to vector<8x128xf32>
    %15 = vector.broadcast %1 : vector<1x128xf32> to vector<8x128xf32>
    %16 = arith.mulf %14, %15 : vector<8x128xf32>
    %17 = vector.extract_strided_slice %0 {offsets = [0, 1], sizes = [8, 1], strides = [1, 1]} : vector<8x128xf32> to vector<8x1xf32>
    %18 = vector.broadcast %17 : vector<8x1xf32> to vector<8x128xf32>
    %19 = vector.broadcast %2 : vector<1x128xf32> to vector<8x128xf32>
    %20 = arith.mulf %18, %19 : vector<8x128xf32>
    %21 = arith.addf %16, %20 : vector<8x128xf32>
    %cst = arith.constant dense<0.000000e+00> : vector<128xf32>
    %22 = vector.multi_reduction <add>, %21, %cst [0] : vector<8x128xf32> to vector<128xf32>
    %23 = vector.shape_cast %22 : vector<128xf32> to vector<1x128xf32>
    %cst_14 = arith.constant 8.000000e+00 : f32
    %24 = vector.broadcast %cst_14 : f32 to vector<1x128xf32>
    %25 = arith.divf %23, %24 : vector<1x128xf32>
    %26 = vector.broadcast %25 : vector<1x128xf32> to vector<8x128xf32>
    %27 = arith.subf %21, %26 : vector<8x128xf32>
    %28 = arith.mulf %27, %27 : vector<8x128xf32>
    %cst_15 = arith.constant dense<0.000000e+00> : vector<128xf32>
    %29 = vector.multi_reduction <add>, %28, %cst_15 [0] : vector<8x128xf32> to vector<128xf32>
    %30 = vector.shape_cast %29 : vector<128xf32> to vector<1x128xf32>
    %cst_16 = arith.constant 8.000000e+00 : f32
    %31 = vector.broadcast %cst_16 : f32 to vector<1x128xf32>
    %32 = arith.divf %30, %31 : vector<1x128xf32>
    %cst_17 = arith.constant 9.99999974E-6 : f32
    %33 = vector.broadcast %cst_17 : f32 to vector<1x128xf32>
    %34 = arith.addf %32, %33 : vector<1x128xf32>
    %35 = math.rsqrt %34 : vector<1x128xf32>
    %36 = arith.mulf %6, %35 : vector<1x128xf32>
    %37 = vector.broadcast %36 : vector<1x128xf32> to vector<8x128xf32>
    %38 = arith.mulf %27, %37 : vector<8x128xf32>
    %39 = vector.broadcast %7 : vector<1x128xf32> to vector<8x128xf32>
    %40 = arith.addf %38, %39 : vector<8x128xf32>
    %cst_18 = arith.constant 0.000000e+00 : f32
    %41 = vector.broadcast %cst_18 : f32 to vector<8x128xf32>
    %42 = arith.maximumf %40, %41 : vector<8x128xf32>
    %cst_19 = arith.constant dense<0.000000e+00> : vector<8x128xf32>
    %43 = tpu.matmul %42, %3, %cst_19 {dimension_numbers = #tpu.dot_dimension_numbers<[1], [0], [0], [1], [0, 0, 1, 1], [], []>} : vector<8x128xf32>, vector<128x128xf32>, vector<8x128xf32> -> vector<8x128xf32>
    %cst_20 = arith.constant dense<0.000000e+00> : vector<128xf32>
    %44 = vector.multi_reduction <add>, %43, %cst_20 [0] : vector<8x128xf32> to vector<128xf32>
    %45 = vector.shape_cast %44 : vector<128xf32> to vector<1x128xf32>
    %cst_21 = arith.constant 8.000000e+00 : f32
    %46 = vector.broadcast %cst_21 : f32 to vector<1x128xf32>
    %47 = arith.divf %45, %46 : vector<1x128xf32>
    %48 = vector.broadcast %47 : vector<1x128xf32> to vector<8x128xf32>
    %49 = arith.subf %43, %48 : vector<8x128xf32>
    %50 = arith.mulf %49, %49 : vector<8x128xf32>
    %cst_22 = arith.constant dense<0.000000e+00> : vector<128xf32>
    %51 = vector.multi_reduction <add>, %50, %cst_22 [0] : vector<8x128xf32> to vector<128xf32>
    %52 = vector.shape_cast %51 : vector<128xf32> to vector<1x128xf32>
    %cst_23 = arith.constant 8.000000e+00 : f32
    %53 = vector.broadcast %cst_23 : f32 to vector<1x128xf32>
    %54 = arith.divf %52, %53 : vector<1x128xf32>
    %cst_24 = arith.constant 9.99999974E-6 : f32
    %55 = vector.broadcast %cst_24 : f32 to vector<1x128xf32>
    %56 = arith.addf %54, %55 : vector<1x128xf32>
    %57 = math.rsqrt %56 : vector<1x128xf32>
    %58 = arith.mulf %8, %57 : vector<1x128xf32>
    %59 = vector.broadcast %58 : vector<1x128xf32> to vector<8x128xf32>
    %60 = arith.mulf %49, %59 : vector<8x128xf32>
    %61 = vector.broadcast %9 : vector<1x128xf32> to vector<8x128xf32>
    %62 = arith.addf %60, %61 : vector<8x128xf32>
    %cst_25 = arith.constant 0.000000e+00 : f32
    %63 = vector.broadcast %cst_25 : f32 to vector<8x128xf32>
    %64 = arith.maximumf %62, %63 : vector<8x128xf32>
    %cst_26 = arith.constant dense<0.000000e+00> : vector<8x128xf32>
    %65 = tpu.matmul %64, %4, %cst_26 {dimension_numbers = #tpu.dot_dimension_numbers<[1], [0], [0], [1], [0, 0, 1, 1], [], []>} : vector<8x128xf32>, vector<128x128xf32>, vector<8x128xf32> -> vector<8x128xf32>
    %cst_27 = arith.constant dense<0.000000e+00> : vector<128xf32>
    %66 = vector.multi_reduction <add>, %65, %cst_27 [0] : vector<8x128xf32> to vector<128xf32>
    %67 = vector.shape_cast %66 : vector<128xf32> to vector<1x128xf32>
    %cst_28 = arith.constant 8.000000e+00 : f32
    %68 = vector.broadcast %cst_28 : f32 to vector<1x128xf32>
    %69 = arith.divf %67, %68 : vector<1x128xf32>
    %70 = vector.broadcast %69 : vector<1x128xf32> to vector<8x128xf32>
    %71 = arith.subf %65, %70 : vector<8x128xf32>
    %72 = arith.mulf %71, %71 : vector<8x128xf32>
    %cst_29 = arith.constant dense<0.000000e+00> : vector<128xf32>
    %73 = vector.multi_reduction <add>, %72, %cst_29 [0] : vector<8x128xf32> to vector<128xf32>
    %74 = vector.shape_cast %73 : vector<128xf32> to vector<1x128xf32>
    %cst_30 = arith.constant 8.000000e+00 : f32
    %75 = vector.broadcast %cst_30 : f32 to vector<1x128xf32>
    %76 = arith.divf %74, %75 : vector<1x128xf32>
    %cst_31 = arith.constant 9.99999974E-6 : f32
    %77 = vector.broadcast %cst_31 : f32 to vector<1x128xf32>
    %78 = arith.addf %76, %77 : vector<1x128xf32>
    %79 = math.rsqrt %78 : vector<1x128xf32>
    %80 = arith.mulf %10, %79 : vector<1x128xf32>
    %81 = vector.broadcast %80 : vector<1x128xf32> to vector<8x128xf32>
    %82 = arith.mulf %71, %81 : vector<8x128xf32>
    %83 = vector.broadcast %11 : vector<1x128xf32> to vector<8x128xf32>
    %84 = arith.addf %82, %83 : vector<8x128xf32>
    %cst_32 = arith.constant 0.000000e+00 : f32
    %85 = vector.broadcast %cst_32 : f32 to vector<8x128xf32>
    %86 = arith.maximumf %84, %85 : vector<8x128xf32>
    %cst_33 = arith.constant dense<0.000000e+00> : vector<8x128xf32>
    %87 = tpu.matmul %86, %5, %cst_33 {dimension_numbers = #tpu.dot_dimension_numbers<[1], [0], [0], [1], [0, 0, 1, 1], [], []>} : vector<8x128xf32>, vector<128x128xf32>, vector<8x128xf32> -> vector<8x128xf32>
    %88 = vector.broadcast %12 : vector<1x128xf32> to vector<8x128xf32>
    %89 = arith.addf %87, %88 : vector<8x128xf32>
    %90 = arith.negf %89 : vector<8x128xf32>
    %91 = math.exp %90 : vector<8x128xf32>
    %cst_34 = arith.constant 1.000000e+00 : f32
    %92 = vector.broadcast %cst_34 : f32 to vector<8x128xf32>
    %93 = arith.addf %92, %91 : vector<8x128xf32>
    %94 = arith.divf %92, %93 : vector<8x128xf32>
    %c0_35 = arith.constant 0 : index
    %c0_36 = arith.constant 0 : index
    %95 = vector.load %arg2[%c0_35, %c0_36] : memref<8x128xf32, #tpu.memory_space<vmem>>, vector<8x128xf32>
    tpu.vector_store %arg2[%c0_35, %c0_36], %94 {strides = array<i32>} : memref<8x128xf32, #tpu.memory_space<vmem>>, vector<8x128xf32>,
    return
  }
}

</mosaic_0001>

<bundles_post_ra>
// kernel: mlp_forward.1
= control target key start
LH: loop header
LB: loop body
LE: loop exit
PB: predicated region body
PF: predicated region fallthrough
CT: control target
= control target key end

     0   :  { %7 = vsyncpa [#allocation3], 0  ;;  %s624_s9 = smov [#allocation2]   ;;  %s714_s0 = inlined_call_operand.vmem [shape: f32[8,128], index: 0, kind: input, shape index: {}]   ;;  %s715_s1 = inlined_call_operand.hbm [shape: f32[520,128], index: 1, kind: input, shape index: {}]   ;;  %s716_s2 = inlined_call_operand.vmem [shape: f32[8,128], index: 2, kind: output, shape index: {}]  }
   0x1   :  { %s15_s10 = sshll.u32 %s624_s9, 4  ;;  %s16_s10 = int_to_ptr.vmem [resolvable:$true] %s15_s10 }
   0x2   :  { %s610_s11 = scalar_lea.vmem %s16_s10, 8320  ;;  %p615_p1 = scmp.lt.s32.totalorder %s16_s10, %s16_s10 }
   0x3   :  { %p611_p0 = scmp.ne.s32.totalorder %s16_s10, %s610_s11  ;;  %p616_p2 = scmp.lt.s32.totalorder %s610_s11, %s610_s11 }
   0x5   :  { %p617_p3 = por %p616_p2, %p615_p1 }
   0x7   :  { %p618_p4 = pnand %p617_p3, %p611_p0 }
   0x9   :  { %621 = shalt.err (!%p618_p4)
}
   0xa   :  { %s625_s12 = smov 128   ;;  %s626_s13 = smov 8  }
   0xb   :  { %21 = dma.hbm_to_vmem [thread:$0]  %s715_s1, 8320, %s16_s10, [#allocation3], %s625_s12, %s625_s12, %s626_s13  }
   0xc   :  { %622 = dma.done.wait [#allocation3], 8320  }
   0xd   :  { %623 = vsyncadd [#allocation3], 4294958976  ;;  %v627_v0 = vmov 0   ;;  %v25_v1 = vld [vmem:[%s714_s0] sm:$0xff]  ;;  %v628_v2 = vmov 1   ;;  %v629_v3 = vmov 0.0   ;;  %v123_v44 = vlaneseq }
   0xe   :  { %590 = vset.pattern.permute.xlu0 %v627_v0  ;;  %478 = vmatprep.subr.mxu0 %v629_v3  ;;  %v43_v4 = vld [vmem:[#allocation2 + $0xf8] sm:$0xff]  ;;  %v42_v5 = vld [vmem:[#allocation2 + $0xf0] sm:$0xff]  ;;  %v41_v6 = vld [vmem:[#allocation2 + $0xe8] sm:$0xff]  ;;  %vm630_vm0 = vmmov 0  }
   0xf   :  { %85 = vperm.xlu0 %590, %v25_v1   ;;  %513 = vmatprep.subr.mxu1 %v629_v3  ;;  %v40_v7 = vld [vmem:[#allocation2 + $0xe0] sm:$0xff]  ;;  %v39_v8 = vld [vmem:[#allocation2 + $0xd8] sm:$0xff]  ;;  %v38_v9 = vld [vmem:[#allocation2 + $0xd0] sm:$0xff]  ;;  %v124_v45 = vshrl.u32 %v123_v44, 7 }
  0x10   :  { %479 = vmatpush3.msra.mxu0 %v43_v4  ;;  %510 = vmatprep.mubr.msk.f32.mxu0 %vm630_vm0, %v629_v3  ;;  %v37_v10 = vld [vmem:[#allocation2 + $0xc8] sm:$0xff]  ;;  %v36_v11 = vld [vmem:[#allocation2 + $0xc0] sm:$0xff]  ;;  %v35_v12 = vld [vmem:[#allocation2 + $0xb8] sm:$0xff] }
  0x11   :  { %480 = vmatprep.subr.mxu0 %v629_v3  ;;  %545 = vmatprep.mubr.msk.f32.mxu1 %vm630_vm0, %v629_v3  ;;  %v34_v13 = vld [vmem:[#allocation2 + $0xb0] sm:$0xff]  ;;  %v33_v14 = vld [vmem:[#allocation2 + $0xa8] sm:$0xff]  ;;  %v32_v15 = vld [vmem:[#allocation2 + $0xa0] sm:$0xff]  ;;  %v674_v47 = vsub.s32 0, %v124_v45 }
  0x12   :  { %481 = vmatpush3.msra.mxu0 %v42_v5  ;;  %v31_v16 = vld [vmem:[#allocation2 + $0x98] sm:$0xff]  ;;  %v30_v17 = vld [vmem:[#allocation2 + $0x90] sm:$0xff]  ;;  %v29_v18 = vld [vmem:[#allocation2 + $0x88] sm:$0xff] }
  0x13   :  { %591 = vset.pattern.permute.xlu0 %v628_v2  ;;  %482 = vmatprep.subr.mxu0 %v629_v3  ;;  %v28_v19 = vld [vmem:[#allocation2 + $0x80] sm:$0xff]  ;;  %v59_v55 = vld [vmem:[#allocation2 + $0x178] sm:$0xff]  ;;  %v58_v56 = vld [vmem:[#allocation2 + $0x170] sm:$0xff] }
  0x14   :  { %94 = vperm.xlu0 %591, %v25_v1   ;;  %483 = vmatpush3.msra.mxu0 %v41_v6  ;;  %v420_v21 = vld [vmem:[#allocation2] ss:$0 sm:$0xff]  ;;  %v421_v22 = vld [vmem:[#allocation2 + $0x1] ss:$0 sm:$0xff]  ;;  %v57_v57 = vld [vmem:[#allocation2 + $0x168] sm:$0xff] }
  0x15   :  { %484 = vmatprep.subr.mxu0 %v629_v3  ;;  %v76_v46 = vld [vmem:[#allocation2 + $0x200] sm:$0x1]  ;;  %v422_v51 = vld [vmem:[#allocation2 + $0x201] ss:$0 sm:$0xff]  ;;  %514 = vmatpush3.msra.mxu1 %v59_v55  ;;  %v55_v59 = vld [vmem:[#allocation2 + $0x158] sm:$0xff] }
  0x16   :  { %485 = vmatpush3.msra.mxu0 %v40_v7  ;;  %515 = vmatprep.subr.mxu1 %v629_v3  ;;  %v56_v58 = vld [vmem:[#allocation2 + $0x160] sm:$0xff]  ;;  %v54_v60 = vld [vmem:[#allocation2 + $0x150] sm:$0xff]  ;;  %v53_v61 = vld [vmem:[#allocation2 + $0x148] sm:$0xff] }
  0x17   :  { %486 = vmatprep.subr.mxu0 %v629_v3  ;;  %516 = vmatpush3.msra.mxu1 %v58_v56  ;;  %v52_v62 = vld [vmem:[#allocation2 + $0x140] sm:$0xff]  ;;  %v51_v63 = vld [vmem:[#allocation2 + $0x138] sm:$0xff]  ;;  %v50_v0 = vld [vmem:[#allocation2 + $0x130] sm:$0xff] }
  0x18   :  { %487 = vmatpush3.msra.mxu0 %v39_v8  ;;  %517 = vmatprep.subr.mxu1 %v629_v3  ;;  %v49_v1 = vld [vmem:[#allocation2 + $0x128] sm:$0xff]  ;;  %v48_v2 = vld [vmem:[#allocation2 + $0x120] sm:$0xff]  ;;  %v47_v4 = vld [vmem:[#allocation2 + $0x118] sm:$0xff] }
  0x19   :  { %488 = vmatprep.subr.mxu0 %v629_v3  ;;  %518 = vmatpush3.msra.mxu1 %v57_v57  ;;  %v46_v5 = vld [vmem:[#allocation2 + $0x110] sm:$0xff]  ;;  %v45_v6 = vld [vmem:[#allocation2 + $0x108] sm:$0xff]  ;;  %v44_v7 = vld [vmem:[#allocation2 + $0x100] sm:$0xff] }
  0x1a   :  { %489 = vmatpush3.msra.mxu0 %v38_v9  ;;  %519 = vmatprep.subr.mxu1 %v629_v3  ;;  %v66_v44 = vld [vmem:[#allocation2 + $0x1b0] sm:$0xff]  ;;  %v65_v45 = vld [vmem:[#allocation2 + $0x1a8] sm:$0xff] }
  0x1b   :  { %490 = vmatprep.subr.mxu0 %v629_v3  ;;  %520 = vmatpush3.msra.mxu1 %v56_v58 }
  0x1c   :  { %491 = vmatpush3.msra.mxu0 %v37_v10  ;;  %521 = vmatprep.subr.mxu1 %v629_v3 }
  0x1d   :  { %492 = vmatprep.subr.mxu0 %v629_v3  ;;  %522 = vmatpush3.msra.mxu1 %v55_v59 }
  0x1e   :  { %493 = vmatpush3.msra.mxu0 %v36_v11  ;;  %523 = vmatprep.subr.mxu1 %v629_v3 }
  0x1f   :  { %494 = vmatprep.subr.mxu0 %v629_v3  ;;  %524 = vmatpush3.msra.mxu1 %v54_v60 }
  0x20   :  { %495 = vmatpush3.msra.mxu0 %v35_v12  ;;  %525 = vmatprep.subr.mxu1 %v629_v3 }
  0x21   :  { %496 = vmatprep.subr.mxu0 %v629_v3  ;;  %526 = vmatpush3.msra.mxu1 %v53_v61 }
  0x22   :  { %497 = vmatpush3.msra.mxu0 %v34_v13  ;;  %527 = vmatprep.subr.mxu1 %v629_v3 }
  0x23   :  { %498 = vmatprep.subr.mxu0 %v629_v3  ;;  %528 = vmatpush3.msra.mxu1 %v52_v62 }
  0x24   :  { %499 = vmatpush3.msra.mxu0 %v33_v14  ;;  %529 = vmatprep.subr.mxu1 %v629_v3 }
  0x25   :  { %500 = vmatprep.subr.mxu0 %v629_v3  ;;  %530 = vmatpush3.msra.mxu1 %v51_v63 }
  0x26   :  { %501 = vmatpush3.msra.mxu0 %v32_v15  ;;  %531 = vmatprep.subr.mxu1 %v629_v3 }
  0x27   :  { %502 = vmatprep.subr.mxu0 %v629_v3  ;;  %532 = vmatpush3.msra.mxu1 %v50_v0 }
  0x28   :  { %503 = vmatpush3.msra.mxu0 %v31_v16  ;;  %533 = vmatprep.subr.mxu1 %v629_v3 }
  0x29   :  { %504 = vmatprep.subr.mxu0 %v629_v3  ;;  %534 = vmatpush3.msra.mxu1 %v49_v1 }
  0x2a   :  { %505 = vmatpush3.msra.mxu0 %v30_v17  ;;  %535 = vmatprep.subr.mxu1 %v629_v3 }
  0x2b   :  { %506 = vmatprep.subr.mxu0 %v629_v3  ;;  %536 = vmatpush3.msra.mxu1 %v48_v2 }
  0x2c   :  { %507 = vmatpush3.msra.mxu0 %v29_v18  ;;  %537 = vmatprep.subr.mxu1 %v629_v3 }
  0x2d   :  { %508 = vmatprep.subr.mxu0 %v629_v3  ;;  %538 = vmatpush3.msra.mxu1 %v47_v4 }
  0x2e   :  { %509 = vmatpush3.msra.mxu0 %v28_v19  ;;  %539 = vmatprep.subr.mxu1 %v629_v3 }
  0x2f   :  { %548 = vmatprep.subr.mxu0 %v629_v3  ;;  %540 = vmatpush3.msra.mxu1 %v46_v5 }
  0x30   :  { %541 = vmatprep.subr.mxu1 %v629_v3 }
  0x31   :  { %542 = vmatpush3.msra.mxu1 %v45_v6 }
  0x32   :  { %543 = vmatprep.subr.mxu1 %v629_v3 }
  0x33   :  { %544 = vmatpush3.msra.mxu1 %v44_v7  ;;  %v80_v7 = vld [vmem:[#allocation2 + $0x204] sm:$0x1] }
  0x8a   :  { %v86_v20 = vpop.permute.xlu0 %85 }
  0x8b   :  { %v92_v24 = vmul.f32 %v420_v21, %v86_v20 }
  0x8f   :  { %v95_v23 = vpop.permute.xlu0 %94 }
  0x90   :  { %v101_v25 = vmul.f32 %v421_v22, %v95_v23 }
  0x92   :  { %v102_v26 = vadd.f32 %v101_v25, %v92_v24 }
  0x94   :  { %v103_v27 = vrot.slane %v102_v26, 4 }
  0x96   :  { %v104_v28 = vadd.f32 %v103_v27, %v102_v26  ;;  %v78_v27 = vld [vmem:[#allocation2 + $0x202] sm:$0x1] }
  0x98   :  { %v105_v29 = vrot.slane %v104_v28, 2 }
  0x9a   :  { %v106_v30 = vadd.f32 %v105_v29, %v104_v28 }
  0x9c   :  { %v107_v31 = vrot.slane %v106_v30, 1 }
  0x9e   :  { %v108_v32 = vadd.f32 %v107_v31, %v106_v30  ;;  %v423_v31 = vld [vmem:[#allocation2 + $0x203] ss:$0 sm:$0xff] }
  0xa0   :  { %v110_v33 = vmul.f32 0.125, %v108_v32 }
  0xa2   :  { %v111_v34 = vsub.f32 %v102_v26, %v110_v33 }
  0xa4   :  { %v112_v35 = vmul.f32 %v111_v34, %v111_v34 }
  0xa6   :  { %v113_v36 = vrot.slane %v112_v35, 4 }
  0xa8   :  { %v114_v37 = vadd.f32 %v113_v36, %v112_v35  ;;  %v75_v35 = vld [vmem:[#allocation2 + $0x1f8] sm:$0xff]  ;;  %v74_v36 = vld [vmem:[#allocation2 + $0x1f0] sm:$0xff] }
  0xaa   :  { %v115_v38 = vrot.slane %v114_v37, 2 }
  0xac   :  { %v116_v39 = vadd.f32 %v115_v38, %v114_v37  ;;  %v73_v37 = vld [vmem:[#allocation2 + $0x1e8] sm:$0xff]  ;;  %v72_v38 = vld [vmem:[#allocation2 + $0x1e0] sm:$0xff] }
  0xae   :  { %v117_v40 = vrot.slane %v116_v39, 1 }
  0xb0   :  { %v118_v41 = vadd.f32 %v117_v40, %v116_v39  ;;  %v71_v39 = vld [vmem:[#allocation2 + $0x1d8] sm:$0xff]  ;;  %v70_v40 = vld [vmem:[#allocation2 + $0x1d0] sm:$0xff] }
  0xb2   :  { %v119_v42 = vmul.f32 0.125, %v118_v41  ;;  %v69_v41 = vld [vmem:[#allocation2 + $0x1c8] sm:$0xff] }
  0xb4   :  { %v120_v43 = vadd.f32 1e-05, %v119_v42  ;;  %v68_v42 = vld [vmem:[#allocation2 + $0x1c0] sm:$0xff] }
  0xb6   :  { %592 = vrsqrt.f32 %v120_v43  ;;  %v67_v43 = vld [vmem:[#allocation2 + $0x1b8] sm:$0xff] }
  0xc3   :  { %v593_v48 = vpop.eup %592 }
  0xc4   :  { %v122_v49 = vmul.f32 %v593_v48, %v76_v46  ;;  %v64_v46 = vld [vmem:[#allocation2 + $0x1a0] sm:$0xff]  ;;  %v63_v48 = vld [vmem:[#allocation2 + $0x198] sm:$0xff] }
  0xc6   :  { %v126_v50 = vrot.slane %v122_v49, %v674_v47  ;;  %v62_v49 = vld [vmem:[#allocation2 + $0x190] sm:$0xff] }
  0xc8   :  { %v127_v52 = vmul.f32 %v126_v50, %v111_v34  ;;  %v61_v50 = vld [vmem:[#allocation2 + $0x188] sm:$0xff] }
  0xca   :  { %v132_v53 = vadd.f32 %v422_v51, %v127_v52  ;;  %v60_v51 = vld [vmem:[#allocation2 + $0x180] sm:$0xff] }
  0xcc   :  { %v133_v54 = vmax.f32 %v132_v53, 0.0 }
  0xce   :  { %511 = vmatmul.mubr.f32.vlgmr.msra.gmra.mxu0 %v133_v54 }
  0xcf   :  { %580 = vmatprep.mubr.msk.f32.mxu0 %vm630_vm0, %v629_v3  ;;  %549 = vmatpush3.msra.mxu0 %v75_v35 }
  0xd0   :  { %550 = vmatprep.subr.mxu0 %v629_v3 }
  0xd1   :  { %551 = vmatpush3.msra.mxu0 %v74_v36 }
  0xd2   :  { %552 = vmatprep.subr.mxu0 %v629_v3 }
  0xd3   :  { %553 = vmatpush3.msra.mxu0 %v73_v37 }
  0xd4   :  { %554 = vmatprep.subr.mxu0 %v629_v3 }
  0xd5   :  { %555 = vmatpush3.msra.mxu0 %v72_v38 }
  0xd6   :  { %556 = vmatprep.subr.mxu0 %v629_v3 }
  0xd7   :  { %557 = vmatpush3.msra.mxu0 %v71_v39 }
  0xd8   :  { %558 = vmatprep.subr.mxu0 %v629_v3 }
  0xd9   :  { %559 = vmatpush3.msra.mxu0 %v70_v40 }
  0xda   :  { %560 = vmatprep.subr.mxu0 %v629_v3 }
  0xdb   :  { %561 = vmatpush3.msra.mxu0 %v69_v41 }
  0xdc   :  { %562 = vmatprep.subr.mxu0 %v629_v3 }
  0xdd   :  { %563 = vmatpush3.msra.mxu0 %v68_v42 }
  0xde   :  { %564 = vmatprep.subr.mxu0 %v629_v3 }
  0xdf   :  { %565 = vmatpush3.msra.mxu0 %v67_v43 }
  0xe0   :  { %566 = vmatprep.subr.mxu0 %v629_v3 }
  0xe1   :  { %567 = vmatpush3.msra.mxu0 %v66_v44 }
  0xe2   :  { %568 = vmatprep.subr.mxu0 %v629_v3 }
  0xe3   :  { %569 = vmatpush3.msra.mxu0 %v65_v45 }
  0xe4   :  { %570 = vmatprep.subr.mxu0 %v629_v3 }
  0xe5   :  { %571 = vmatpush3.msra.mxu0 %v64_v46 }
  0xe6   :  { %572 = vmatprep.subr.mxu0 %v629_v3 }
  0xe7   :  { %573 = vmatpush3.msra.mxu0 %v63_v48 }
  0xe8   :  { %574 = vmatprep.subr.mxu0 %v629_v3 }
  0xe9   :  { %575 = vmatpush3.msra.mxu0 %v62_v49 }
  0xea   :  { %576 = vmatprep.subr.mxu0 %v629_v3 }
  0xeb   :  { %577 = vmatpush3.msra.mxu0 %v61_v50 }
  0xec   :  { %578 = vmatprep.subr.mxu0 %v629_v3 }
  0xed   :  { %579 = vmatpush3.msra.mxu0 %v60_v51 }
 0x18e   :  { %v200_v8 = vpop.f32.mrf.mxu0 }
 0x18f   :  { %v204_v9 = vrot.slane %v200_v8, 4 }
 0x190   :  { %v512_v10 = vpop.f32.mrf.mxu0 }
 0x191   :  { %v205_v11 = vadd.f32 %v204_v9, %v200_v8 }
 0x193   :  { %v206_v12 = vrot.slane %v205_v11, 2 }
 0x195   :  { %v207_v13 = vadd.f32 %v206_v12, %v205_v11  ;;  %v424_v11 = vld [vmem:[#allocation2 + $0x205] ss:$0 sm:$0xff] }
 0x197   :  { %v208_v14 = vrot.slane %v207_v13, 1 }
 0x199   :  { %v209_v15 = vadd.f32 %v208_v14, %v207_v13 }
 0x19b   :  { %v210_v16 = vmul.f32 0.125, %v209_v15  ;;  %v425_v15 = vld [vmem:[#allocation2 + $0x206] ss:$0 sm:$0xff] }
 0x19d   :  { %v211_v17 = vsub.f32 %v200_v8, %v210_v16 }
 0x19f   :  { %v212_v18 = vmul.f32 %v211_v17, %v211_v17 }
 0x1a1   :  { %v213_v19 = vrot.slane %v212_v18, 4 }
 0x1a3   :  { %v214_v20 = vadd.f32 %v213_v19, %v212_v18 }
 0x1a5   :  { %v215_v21 = vrot.slane %v214_v20, 2 }
 0x1a7   :  { %v216_v22 = vadd.f32 %v215_v21, %v214_v20 }
 0x1a9   :  { %v217_v23 = vrot.slane %v216_v22, 1 }
 0x1ab   :  { %v218_v24 = vadd.f32 %v217_v23, %v216_v22 }
 0x1ad   :  { %v219_v25 = vmul.f32 0.125, %v218_v24 }
 0x1af   :  { %v220_v26 = vadd.f32 1e-05, %v219_v25 }
 0x1b1   :  { %594 = vrsqrt.f32 %v220_v26 }
 0x1be   :  { %v595_v28 = vpop.eup %594 }
 0x1bf   :  { %v222_v29 = vmul.f32 %v595_v28, %v78_v27 }
 0x1c1   :  { %v226_v30 = vrot.slane %v222_v29, %v674_v47 }
 0x1c3   :  { %v227_v32 = vmul.f32 %v226_v30, %v211_v17 }
 0x1c5   :  { %v232_v33 = vadd.f32 %v423_v31, %v227_v32 }
 0x1c7   :  { %v233_v34 = vmax.f32 %v232_v33, 0.0 }
 0x1c9   :  { %546 = vmatmul.mubr.f32.vlgmr.msra.gmra.mxu1 %v233_v34 }
 0x289   :  { %v300_v52 = vpop.f32.mrf.mxu1 }
 0x28a   :  { %v304_v53 = vrot.slane %v300_v52, 4 }
 0x28b   :  { %v547_v54 = vpop.f32.mrf.mxu1 }
 0x28c   :  { %v305_v55 = vadd.f32 %v304_v53, %v300_v52 }
 0x28e   :  { %v306_v56 = vrot.slane %v305_v55, 2 }
 0x290   :  { %v307_v57 = vadd.f32 %v306_v56, %v305_v55 }
 0x292   :  { %v308_v58 = vrot.slane %v307_v57, 1 }
 0x294   :  { %v309_v59 = vadd.f32 %v308_v58, %v307_v57 }
 0x296   :  { %v310_v60 = vmul.f32 0.125, %v309_v59 }
 0x298   :  { %v311_v61 = vsub.f32 %v300_v52, %v310_v60 }
 0x29a   :  { %v312_v62 = vmul.f32 %v311_v61, %v311_v61 }
 0x29c   :  { %v313_v63 = vrot.slane %v312_v62, 4 }
 0x29e   :  { %v314_v0 = vadd.f32 %v313_v63, %v312_v62 }
 0x2a0   :  { %v315_v1 = vrot.slane %v314_v0, 2 }
 0x2a2   :  { %v316_v2 = vadd.f32 %v315_v1, %v314_v0 }
 0x2a4   :  { %v317_v4 = vrot.slane %v316_v2, 1 }
 0x2a6   :  { %v318_v5 = vadd.f32 %v317_v4, %v316_v2 }
 0x2a8   :  { %v319_v6 = vmul.f32 0.125, %v318_v5 }
 0x2aa   :  { %v320_v3 = vadd.f32 1e-05, %v319_v6 }
 0x2ac   :  { %596 = vrsqrt.f32 %v320_v3 }
 0x2b9   :  { %v597_v8 = vpop.eup %596 }
 0x2ba   :  { %v322_v9 = vmul.f32 %v597_v8, %v80_v7 }
 0x2bc   :  { %v326_v10 = vrot.slane %v322_v9, %v674_v47 }
 0x2be   :  { %v327_v12 = vmul.f32 %v326_v10, %v311_v61 }
 0x2c0   :  { %v332_v13 = vadd.f32 %v424_v11, %v327_v12 }
 0x2c2   :  { %v333_v14 = vmax.f32 %v332_v13, 0.0 }
 0x2c4   :  { %581 = vmatmul.mubr.f32.vlgmr.msra.gmra.mxu0 %v333_v14 }
 0x384   :  { %v404_v16 = vpop.f32.mrf.mxu0 }
 0x385   :  { %v405_v17 = vadd.f32 %v425_v15, %v404_v16 }
 0x386   :  { %v582_v18 = vpop.f32.mrf.mxu0 }
 0x387   :  { %v426_v19 = vmul.f32 -1.442695, %v405_v17 }
 0x389   :  { %598 = vpow2.f32 %v426_v19 }
 0x396   :  { %v599_v20 = vpop.eup %598 }
 0x397   :  { %v411_v21 = vadd.f32 1.0, %v599_v20 }
 0x399   :  { %600 = vrcp.f32 %v411_v21 }
 0x3a6   :  { %v601_v22 = vpop.eup %600 }
 0x3a7   :  { %414 = vst [vmem:[%s716_s2] sm:$0xff] %v601_v22 }
 0x3a8   :  { %419 = vsyncpa [#allocation3], 1 }

</bundles_post_ra>
